<compile_context>
chip_gen: v7x
topology: tpu7x:2x2x1
jax: 0.10.0
libtpu: 0.0.40
codegen_flags: <defaults>
</compile_context>

<pallas_src>
import math

import jax
import jax.numpy as jnp
from jax import lax
from jax.experimental import pallas as pl
from jax.experimental.pallas import tpu as pltpu

# Finite sentinel for masked scores (avoids -inf -> exp(nan) paths on the VPU).
_NEG_BIG = float(jnp.finfo(jnp.float32).min) / 2.0


def _round_up(x, m):
    return ((x + m - 1) // m) * m


# ---------------------------------------------------------------------------
# Pass 1: fused QKV projection. One MXU pass per sequence tile, scale folded
# into Q so it touches (tile, d_out) instead of the (TQ, TKV) score matrix.
# ---------------------------------------------------------------------------
def _make_proj_kernel(d_out_pad, scale):
    def kernel(x_ref, w_ref, q_ref, k_ref, v_ref):
        qkv = jnp.dot(x_ref[...], w_ref[...], preferred_element_type=jnp.float32)
        q_ref[...] = (qkv[:, :d_out_pad] * scale).astype(q_ref.dtype)
        k_ref[...] = qkv[:, d_out_pad:2 * d_out_pad].astype(k_ref.dtype)
        v_ref[...] = qkv[:, 2 * d_out_pad:].astype(v_ref.dtype)

    return kernel


# ---------------------------------------------------------------------------
# Pass 2: flash-style attention, online softmax over KV tiles.
# ---------------------------------------------------------------------------
def _make_attn_kernel(*, seq_len, seq_pad, block_kv):
    def kernel(q_ref, k_ref, v_ref, o_ref, m_sc, l_sc, acc_sc):
        ki = pl.program_id(1)

        @pl.when(ki == 0)
        def _init():
            m_sc[...] = jnp.full(m_sc.shape, _NEG_BIG, dtype=m_sc.dtype)
            l_sc[...] = jnp.zeros(l_sc.shape, dtype=l_sc.dtype)
            acc_sc[...] = jnp.zeros(acc_sc.shape, dtype=acc_sc.dtype)

        # scores = (Q*scale) @ K^T, contracting last dims (no materialized K.T).
        s = lax.dot_general(q_ref[...], k_ref[...],
                            dimension_numbers=(((1,), (1,)), ((), ())),
                            preferred_element_type=jnp.float32)   # (TQ, TKV)

        if seq_pad != seq_len:  # static: mask padded KV rows with a FINITE sentinel
            col = ki * block_kv + lax.broadcasted_iota(jnp.int32, s.shape, 1)
            s = jnp.where(col < seq_len, s, _NEG_BIG)

        # Online (streaming) softmax update; all rescale math kept in f32.
        m_prev = m_sc[...]
        m_new = jnp.maximum(m_prev, jnp.max(s, axis=-1, keepdims=True))
        alpha = jnp.exp(m_prev - m_new)
        p = jnp.exp(s - m_new)
        l_sc[...] = alpha * l_sc[...] + jnp.sum(p, axis=-1, keepdims=True)
        acc_sc[...] = alpha * acc_sc[...] + jnp.dot(
            p.astype(v_ref.dtype), v_ref[...], preferred_element_type=jnp.float32)
        m_sc[...] = m_new

        @pl.when(ki == pl.num_programs(1) - 1)
        def _finalize():
            inv_l = pl.reciprocal(l_sc[...], approx=True)
            o_ref[...] = (acc_sc[...] * inv_l).astype(o_ref.dtype)

    return kernel


def self_attention_v1(x, w_queries, w_keys, w_values, *,
                      block_q=256, block_kv=512, mxu_dtype=None):
    """Pallas forward pass equivalent to SelfAttentionV1.forward(x).

    mxu_dtype: optional MXU-operand dtype (e.g. jnp.bfloat16) — 3-4x faster
    matmuls on v5e/v6e/v7x, accumulation stays f32. Default matches x.dtype.
    """
    S, d_in = x.shape
    d_out = w_queries.shape[1]
    scale = 1.0 / math.sqrt(d_out)  # torch uses keys.shape[-1] ** 0.5 (unpadded)

    if mxu_dtype is not None:
        compute_dtype = jnp.dtype(mxu_dtype)
    elif x.dtype == jnp.bfloat16:
        compute_dtype = jnp.dtype(jnp.bfloat16)
    else:
        compute_dtype = jnp.dtype(jnp.float32)

    # Lane-dense feature dims (multiples of 128).
    d_in_p = _round_up(max(d_in, 128), 128)
    d_out_p = _round_up(max(d_out, 128), 128)

    # Decoupled, larger tiles to amortize the ~0.35us per-grid-step overhead and
    # feed the 256-wide MXU on v6e/v7x.  block_kv is kept a multiple of block_q
    # so every tile divides the padded sequence length.
    block_q = _round_up(block_q, 8)
    block_kv = _round_up(block_kv, block_q)
    sub = 16 if compute_dtype == jnp.dtype(jnp.bfloat16) else 8

    S8 = _round_up(S, 8)
    if S8 <= block_q:
        S_p = S8
        tkv = S8
        # Split into 2 query tiles when layout allows, so both v7x TCs get work.
        tq = S8 // 2 if (S8 % (2 * sub) == 0) else S8
    else:
        tq = block_q
        S_p = _round_up(S8, tq)
        tkv = block_kv if S_p % block_kv == 0 else tq

    # Zero padding is inert: padded x rows and padded weight columns are zero,
    # so padded K/V rows/cols are zero; padded KV rows are additionally masked.
    x_p = jnp.pad(x, ((0, S_p - S), (0, d_in_p - d_in))).astype(compute_dtype)

    def _pad_w(w):
        return jnp.pad(w, ((0, d_in_p - d_in), (0, d_out_p - d_out)))

    w_qkv = jnp.concatenate(
        [_pad_w(w_queries), _pad_w(w_keys), _pad_w(w_values)],
        axis=1).astype(compute_dtype)

    c_item = compute_dtype.itemsize
    o_item = jnp.dtype(x.dtype).itemsize

    # ---- Pass 1: fused QKV projection (each x row projected exactly once) ----
    n_proj = S_p // tkv
    proj_cost = pl.CostEstimate(
        flops=2 * S_p * d_in_p * 3 * d_out_p,
        transcendentals=0,
        bytes_accessed=(S_p * d_in_p + d_in_p * 3 * d_out_p
                        + 3 * S_p * d_out_p) * c_item,
    )
    qkv_struct = jax.ShapeDtypeStruct((S_p, d_out_p), compute_dtype)
    q, k, v = pl.pallas_call(
        _make_proj_kernel(d_out_p, scale),
        out_shape=(qkv_struct, qkv_struct, qkv_struct),
        grid_spec=pltpu.PrefetchScalarGridSpec(
            num_scalar_prefetch=0,
            grid=(n_proj,),
            in_specs=[
                pl.BlockSpec((tkv, d_in_p), lambda i: (i, 0)),          # x tile
                pl.BlockSpec((d_in_p, 3 * d_out_p), lambda i: (0, 0)),  # fused W
            ],
            out_specs=(
                pl.BlockSpec((tkv, d_out_p), lambda i: (i, 0)),         # Q*scale
                pl.BlockSpec((tkv, d_out_p), lambda i: (i, 0)),         # K
                pl.BlockSpec((tkv, d_out_p), lambda i: (i, 0)),         # V
            ),
        ),
        compiler_params=pltpu.CompilerParams(dimension_semantics=("parallel",)),
        cost_estimate=proj_cost,
    )(x_p, w_qkv)

    # ---- Pass 2: flash attention over the precomputed Q/K/V tiles ----
    n_q = S_p // tq
    n_kv = S_p // tkv
    attn_cost = pl.CostEstimate(
        flops=4 * S_p * S_p * d_out_p,
        transcendentals=S_p * S_p,
        # Q read once; K and V are re-streamed once per query tile; O written once.
        bytes_accessed=(S_p * d_out_p * (1 + 2 * n_q)) * c_item
                       + S_p * d_out_p * o_item,
    )
    out_padded = pl.pallas_call(
        _make_attn_kernel(seq_len=S, seq_pad=S_p, block_kv=tkv),
        out_shape=jax.ShapeDtypeStruct((S_p, d_out_p), x.dtype),
        grid_spec=pltpu.PrefetchScalarGridSpec(
            num_scalar_prefetch=0,
            grid=(n_q, n_kv),
            in_specs=[
                pl.BlockSpec((tq, d_out_p), lambda qi, ki: (qi, 0)),   # Q tile
                pl.BlockSpec((tkv, d_out_p), lambda qi, ki: (ki, 0)),  # K tile
                pl.BlockSpec((tkv, d_out_p), lambda qi, ki: (ki, 0)),  # V tile
            ],
            out_specs=pl.BlockSpec((tq, d_out_p), lambda qi, ki: (qi, 0)),
            scratch_shapes=[
                pltpu.VMEM((tq, 1), jnp.float32),        # running max m
                pltpu.VMEM((tq, 1), jnp.float32),        # running sum l
                pltpu.VMEM((tq, d_out_p), jnp.float32),  # output accumulator
            ],
        ),
        compiler_params=pltpu.CompilerParams(
            dimension_semantics=("parallel", "arbitrary")),
        cost_estimate=attn_cost,
    )(q, k, v)

    # Strip seq / feature padding.
    return out_padded[:S, :d_out]


def _reference(x, w_q, w_k, w_v):
    # HIGHEST precision so the f32 reference is not silently computed with
    # single-pass bf16 MXU (the TPU default for f32 matmuls).
    hi = jax.lax.Precision.HIGHEST
    queries = jnp.dot(x, w_q, precision=hi)
    keys = jnp.dot(x, w_k, precision=hi)
    values = jnp.dot(x, w_v, precision=hi)
    scores = jnp.dot(queries, keys.T, precision=hi)
    weights = jax.nn.softmax(scores / jnp.sqrt(jnp.float32(keys.shape[-1])), axis=-1)
    return jnp.dot(weights, values, precision=hi)


def _run_case(seed, seq_len, d_in, d_out, rtol=5e-3, atol=1e-2, **kw):
    kx, kq, kk, kv = jax.random.split(jax.random.PRNGKey(seed), 4)
    x = jax.random.uniform(kx, (seq_len, d_in), dtype=jnp.float32)
    w_q = jax.random.uniform(kq, (d_in, d_out), dtype=jnp.float32)
    w_k = jax.random.uniform(kk, (d_in, d_out), dtype=jnp.float32)
    w_v = jax.random.uniform(kv, (d_in, d_out), dtype=jnp.float32)
    out = jax.block_until_ready(self_attention_v1(x, w_q, w_k, w_v, **kw))
    ref = _reference(x, w_q, w_k, w_v)
    assert out.shape == (seq_len, d_out)
    assert jnp.allclose(out, ref, rtol=rtol, atol=atol), (
        f"mismatch vs reference (S={seq_len}, d_in={d_in}, d_out={d_out})")


if __name__ == "__main__":
    # Small shapes consistent with the module: seq=8, d_in=32, d_out=16 (PRNGKey(0)).
    _run_case(0, 8, 32, 16)

    # Non-multiple-of-8 sequence -> exercises the padded / masked KV path.
    _run_case(1, 100, 96, 80)

    # Longer sequence -> decoupled 256x512 tiles, grid (4, 2), multi-step online softmax.
    _run_case(2, 1024, 128, 64)

    # bf16 MXU-operand path (v5e/v6e/v7x fast path): smoke check only, since the
    # uniform(0,1) test data produces huge logits that make a tight bf16-vs-f32
    # softmax comparison meaningless.
    kx, kq, kk, kv = jax.random.split(jax.random.PRNGKey(3), 4)
    xb = jax.random.uniform(kx, (512, 128), dtype=jnp.float32)
    wqb = jax.random.uniform(kq, (128, 64), dtype=jnp.float32)
    wkb = jax.random.uniform(kk, (128, 64), dtype=jnp.float32)
    wvb = jax.random.uniform(kv, (128, 64), dtype=jnp.float32)
    outb = jax.block_until_ready(
        self_attention_v1(xb, wqb, wkb, wvb, mxu_dtype=jnp.bfloat16))
    assert outb.shape == (512, 64)
    assert bool(jnp.all(jnp.isfinite(outb)))

    print("KERNEL_OK")
</pallas_src>

<mosaic_0001>
module attributes {stable_mosaic.version = 11 : i64} {
  func.func @kernel(%arg0: i32, %arg1: memref<8x128xf32, #tpu.memory_space<vmem>>, %arg2: memref<128x384xf32, #tpu.memory_space<vmem>>, %arg3: memref<8x128xf32, #tpu.memory_space<vmem>>, %arg4: memref<8x128xf32, #tpu.memory_space<vmem>>, %arg5: memref<8x128xf32, #tpu.memory_space<vmem>>) attributes {dimension_semantics = [#tpu.dimension_semantics<parallel>], iteration_bounds = array<i64: 1>, scalar_prefetch = 0 : i64, scratch_operands = 0 : i64, tpu.core_type = #tpu.core_type<tc>, window_params = [{transform_indices = @transform_0, window_bounds = array<i64: 8, 128>}, {pipeline_mode = #tpu.pipeline_mode<synchronous>, transform_indices = @transform_1, window_bounds = array<i64: 128, 384>}, {transform_indices = @transform_2, window_bounds = array<i64: 8, 128>}, {transform_indices = @transform_3, window_bounds = array<i64: 8, 128>}, {transform_indices = @transform_4, window_bounds = array<i64: 8, 128>}]} {
    %c0 = arith.constant 0 : index
    %c0_0 = arith.constant 0 : index
    %0 = vector.load %arg1[%c0, %c0_0] : memref<8x128xf32, #tpu.memory_space<vmem>>, vector<8x128xf32>
    %c0_1 = arith.constant 0 : index
    %c0_2 = arith.constant 0 : index
    %1 = vector.load %arg2[%c0_1, %c0_2] : memref<128x384xf32, #tpu.memory_space<vmem>>, vector<128x384xf32>
    %cst = arith.constant dense<0.000000e+00> : vector<8x384xf32>
    %2 = tpu.matmul %0, %1, %cst {dimension_numbers = #tpu.dot_dimension_numbers<[1], [0], [0], [1], [0, 0, 1, 1], [], []>} : vector<8x128xf32>, vector<128x384xf32>, vector<8x384xf32> -> vector<8x384xf32>
    %3 = vector.extract_strided_slice %2 {offsets = [0, 0], sizes = [8, 128], strides = [1, 1]} : vector<8x384xf32> to vector<8x128xf32>
    %cst_3 = arith.constant 2.500000e-01 : f32
    %4 = vector.broadcast %cst_3 : f32 to vector<8x128xf32>
    %5 = arith.mulf %3, %4 : vector<8x128xf32>
    %c0_4 = arith.constant 0 : index
    %c0_5 = arith.constant 0 : index
    %6 = vector.load %arg3[%c0_4, %c0_5] : memref<8x128xf32, #tpu.memory_space<vmem>>, vector<8x128xf32>
    tpu.vector_store %arg3[%c0_4, %c0_5], %5 {strides = array<i32>} : memref<8x128xf32, #tpu.memory_space<vmem>>, vector<8x128xf32>,
    %7 = vector.extract_strided_slice %2 {offsets = [0, 128], sizes = [8, 128], strides = [1, 1]} : vector<8x384xf32> to vector<8x128xf32>
    %c0_6 = arith.constant 0 : index
    %c0_7 = arith.constant 0 : index
    %8 = vector.load %arg4[%c0_6, %c0_7] : memref<8x128xf32, #tpu.memory_space<vmem>>, vector<8x128xf32>
    tpu.vector_store %arg4[%c0_6, %c0_7], %7 {strides = array<i32>} : memref<8x128xf32, #tpu.memory_space<vmem>>, vector<8x128xf32>,
    %9 = vector.extract_strided_slice %2 {offsets = [0, 256], sizes = [8, 128], strides = [1, 1]} : vector<8x384xf32> to vector<8x128xf32>
    %c0_8 = arith.constant 0 : index
    %c0_9 = arith.constant 0 : index
    %10 = vector.load %arg5[%c0_8, %c0_9] : memref<8x128xf32, #tpu.memory_space<vmem>>, vector<8x128xf32>
    tpu.vector_store %arg5[%c0_8, %c0_9], %9 {strides = array<i32>} : memref<8x128xf32, #tpu.memory_space<vmem>>, vector<8x128xf32>,
    return
  }
  func.func @transform_0(%arg0: i32) -> (i32, i32) {
    %c0_i32 = arith.constant 0 : i32
    %c0_i32_0 = arith.constant 0 : i32
    return %arg0, %c0_i32 : i32, i32
  }
  func.func @transform_1(%arg0: i32) -> (i32, i32) {
    %c0_i32 = arith.constant 0 : i32
    %c0_i32_0 = arith.constant 0 : i32
    %c0_i32_1 = arith.constant 0 : i32
    return %c0_i32, %c0_i32_0 : i32, i32
  }
  func.func @transform_2(%arg0: i32) -> (i32, i32) {
    %c0_i32 = arith.constant 0 : i32
    %c0_i32_0 = arith.constant 0 : i32
    return %arg0, %c0_i32 : i32, i32
  }
  func.func @transform_3(%arg0: i32) -> (i32, i32) {
    %c0_i32 = arith.constant 0 : i32
    %c0_i32_0 = arith.constant 0 : i32
    return %arg0, %c0_i32 : i32, i32
  }
  func.func @transform_4(%arg0: i32) -> (i32, i32) {
    %c0_i32 = arith.constant 0 : i32
    %c0_i32_0 = arith.constant 0 : i32
    return %arg0, %c0_i32 : i32, i32
  }
}

</mosaic_0001>

<bundles_post_ra>
// kernel: tpu_custom_call.1
= control target key start
LH: loop header
LB: loop body
LE: loop exit
PB: predicated region body
PF: predicated region fallthrough
CT: control target
= control target key end

     0   :  { %10 = vsyncpa [#allocation3], 0  ;;  %s639_s0 = inlined_call_operand.hbm [shape: f32[8,128], index: 0, kind: input, shape index: {}]   ;;  %s640_s1 = inlined_call_operand.hbm [shape: f32[128,384], index: 1, kind: input, shape index: {}]   ;;  %s641_s2 = inlined_call_operand.hbm [shape: f32[8,128], index: 2, kind: output, shape index: {0}]   ;;  %s642_s3 = inlined_call_operand.hbm [shape: f32[8,128], index: 3, kind: output, shape index: {1}]   ;;  %s643_s4 = inlined_call_operand.hbm [shape: f32[8,128], index: 4, kind: output, shape index: {2}]  }
   0x1   :  { %11 = vsyncpa [#allocation6], 0 }
   0x2   :  { %12 = vsyncpa [#allocation4], 0 }
   0x3   :  { %13 = vsyncpa [#allocation9], 0  ;;  %s515_s15 = smov [#allocation2]   ;;  %s516_s17 = smov [#allocation5]  }
   0x4   :  { %s20_s16 = sshll.u32 %s515_s15, 4  ;;  %s29_s18 = sshll.u32 %s516_s17, 4  ;;  %s21_s16 = int_to_ptr.vmem [resolvable:$true] %s20_s16  ;;  %s550_s18 = int_to_ptr.vmem [resolvable:$true] %s29_s18 }
   0x5   :  { %s397_s21 = scalar_lea.hbm %s639_s0, 128 }
   0x6   :  { %p398_p0 = scmp.ne.s32.totalorder %s639_s0, %s397_s21  ;;  %p401_p1 = scmp.lt.u32.totalorder %s397_s21, %s639_s0 }
   0x8   :  { %p403_p2 = pnand %p401_p1, %p398_p0 }
   0xa   :  { %406 = shalt.err (!%p403_p2)
}
   0xb   :  { %s407_s26 = scalar_lea.vmem %s21_s16, 128  ;;  %p412_p4 = scmp.lt.s32.totalorder %s21_s16, %s21_s16 }
   0xc   :  { %p408_p3 = scmp.ne.s32.totalorder %s21_s16, %s407_s26  ;;  %p413_p5 = scmp.lt.s32.totalorder %s407_s26, %s407_s26 }
   0xe   :  { %p414_p6 = por %p413_p5, %p412_p4 }
  0x10   :  { %p415_p7 = pnand %p414_p6, %p408_p3 }
  0x12   :  { %418 = shalt.err (!%p415_p7)
}
  0x13   :  { %23 = dma.hbm_to_vmem [thread:$0]  %s639_s0, 128, %s21_s16, [#allocation3]  }
  0x14   :  { %s419_s5 = scalar_lea.hbm %s640_s1, 6144 }
  0x15   :  { %p420_p8 = scmp.ne.s32.totalorder %s640_s1, %s419_s5  ;;  %p423_p9 = scmp.lt.u32.totalorder %s419_s5, %s640_s1 }
  0x17   :  { %p425_p10 = pnand %p423_p9, %p420_p8 }
  0x19   :  { %428 = shalt.err (!%p425_p10)
}
  0x1a   :  { %s429_s10 = scalar_lea.vmem %s550_s18, 6144  ;;  %p434_p12 = scmp.lt.s32.totalorder %s550_s18, %s550_s18 }
  0x1b   :  { %p430_p11 = scmp.ne.s32.totalorder %s550_s18, %s429_s10  ;;  %p435_p13 = scmp.lt.s32.totalorder %s429_s10, %s429_s10 }
  0x1d   :  { %p436_p0 = por %p435_p13, %p434_p12 }
  0x1f   :  { %p437_p1 = pnand %p436_p0, %p430_p11 }
  0x21   :  { %440 = shalt.err (!%p437_p1)
}
  0x22   :  { %s517_s0 = smov 384   ;;  %s518_s11 = smov 24  }
  0x23   :  { %35 = dma.hbm_to_vmem [thread:$0]  %s640_s1, 6144, %s550_s18, [#allocation6], %s517_s0, %s517_s0, %s518_s11  }
  0x24   :  { %507 = dma.done.wait [#allocation3], 128  }
  0x25   :  { %508 = vsyncadd [#allocation3], 4294967168 }
  0x26   :  { %509 = dma.done.wait [#allocation6], 6144  }
  0x27   :  { %510 = vsyncadd [#allocation6], 4294961152  ;;  %v519_v0 = vmov 0.0|0.0   ;;  %v520_v1 = vmov 0.0   ;;  %vm521_vm0 = vmmov 0   ;;  %v44_v2 = vld [vmem:[#allocation5 + $0x8] sm:$0xff] }
  0x28   :  { %363 = vmatprep.subr.bf16.mxu1 %v519_v0  ;;  %155 = vmatprep.mubr.f32.mxu0 %v520_v1  ;;  %v47_v3 = vld [vmem:[#allocation5 + $0x20] sm:$0xff]  ;;  %v46_v6 = vld [vmem:[#allocation5 + $0x18] sm:$0xff]  ;;  %v45_v7 = vld [vmem:[#allocation5 + $0x10] sm:$0xff]  ;;  %s522_s1 = smov [#allocation8]   ;;  %s523_s15 = smov [#allocation7]  }
  0x29   :  { %328 = vmatprep.mubr.msk.f32.mxu1 %vm521_vm0, %v520_v1  ;;  %v43_v4 = vld [vmem:[#allocation5] sm:$0xff]  ;;  %v331_v5 = vpack.c.bf16 %v47_v3, %v44_v2  ;;  %v48_v8 = vld [vmem:[#allocation5 + $0x28] sm:$0xff]  ;;  %v50_v11 = vld [vmem:[#allocation5 + $0x38] sm:$0xff]  ;;  %s252_s14 = sshll.u32 %s522_s1, 4  ;;  %s242_s16 = sshll.u32 %s523_s15, 4  ;;  %s253_s14 = int_to_ptr.vmem [resolvable:$true] %s252_s14  ;;  %s589_s16 = int_to_ptr.vmem [resolvable:$true] %s242_s16 }
  0x2a   :  { %v333_v9 = vpack.c.bf16 %v46_v6, %v43_v4  ;;  %v364_v10 = vpack.c.bf16 %v48_v8, %v45_v7  ;;  %v53_v12 = vld [vmem:[#allocation5 + $0x50] sm:$0xff]  ;;  %v52_v15 = vld [vmem:[#allocation5 + $0x48] sm:$0xff]  ;;  %v51_v16 = vld [vmem:[#allocation5 + $0x40] sm:$0xff]  ;;  %s524_s17 = smov [#allocation10]   ;;  %s441_s19 = scalar_lea.vmem %s253_s14, 128 }
  0x2b   :  { %v49_v13 = vld [vmem:[#allocation5 + $0x30] sm:$0xff]  ;;  %332 = vmatprep.subr.bf16.mxu0 %v331_v5  ;;  %v335_v14 = vpack.c.bf16 %v53_v12, %v50_v11  ;;  %v54_v17 = vld [vmem:[#allocation5 + $0x58] sm:$0xff]  ;;  %v56_v20 = vld [vmem:[#allocation5 + $0x68] sm:$0xff]  ;;  %s262_s18 = sshll.u32 %s524_s17, 4  ;;  %p442_p2 = scmp.ne.s32.totalorder %s253_s14, %s441_s19  ;;  %s591_s18 = int_to_ptr.vmem [resolvable:$true] %s262_s18 }
  0x2c   :  { %334 = vmatpush1.bf16.msra.mxu0 %v333_v9  ;;  %365 = vmatpush3.bf16.msra.mxu1 %v364_v10  ;;  %v337_v18 = vpack.c.bf16 %v52_v15, %v49_v13  ;;  %v367_v19 = vpack.c.bf16 %v54_v17, %v51_v16  ;;  %v59_v21 = vld [vmem:[#allocation5 + $0x80] sm:$0xff]  ;;  %v58_v24 = vld [vmem:[#allocation5 + $0x78] sm:$0xff]  ;;  %v57_v25 = vld [vmem:[#allocation5 + $0x70] sm:$0xff]  ;;  %p446_p3 = scmp.lt.s32.totalorder %s253_s14, %s253_s14  ;;  %p447_p4 = scmp.lt.s32.totalorder %s441_s19, %s441_s19 }
  0x2d   :  { %v55_v22 = vld [vmem:[#allocation5 + $0x60] sm:$0xff]  ;;  %336 = vmatprep.subr.bf16.mxu0 %v335_v14  ;;  %366 = vmatprep.subr.bf16.mxu1 %v519_v0  ;;  %v339_v23 = vpack.c.bf16 %v59_v21, %v56_v20  ;;  %v60_v26 = vld [vmem:[#allocation5 + $0x88] sm:$0xff]  ;;  %v62_v27 = vld [vmem:[#allocation5 + $0x98] sm:$0xff] }
  0x2e   :  { %v65_v28 = vld [vmem:[#allocation5 + $0xb0] sm:$0xff]  ;;  %v341_v29 = vpack.c.bf16 %v58_v24, %v55_v22  ;;  %v370_v30 = vpack.c.bf16 %v60_v26, %v57_v25  ;;  %v64_v33 = vld [vmem:[#allocation5 + $0xa8] sm:$0xff]  ;;  %v63_v34 = vld [vmem:[#allocation5 + $0xa0] sm:$0xff]  ;;  %p448_p5 = por %p447_p4, %p446_p3 }
  0x2f   :  { %v61_v31 = vld [vmem:[#allocation5 + $0x90] sm:$0xff]  ;;  %v343_v32 = vpack.c.bf16 %v65_v28, %v62_v27  ;;  %v66_v35 = vld [vmem:[#allocation5 + $0xb8] sm:$0xff]  ;;  %v68_v36 = vld [vmem:[#allocation5 + $0xc8] sm:$0xff] }
  0x30   :  { %338 = vmatpush1.bf16.msra.mxu0 %v337_v18  ;;  %368 = vmatpush3.bf16.msra.mxu1 %v367_v19  ;;  %v71_v37 = vld [vmem:[#allocation5 + $0xe0] sm:$0xff]  ;;  %v345_v38 = vpack.c.bf16 %v64_v33, %v61_v31  ;;  %v373_v39 = vpack.c.bf16 %v66_v35, %v63_v34  ;;  %v70_v42 = vld [vmem:[#allocation5 + $0xd8] sm:$0xff]  ;;  %v69_v43 = vld [vmem:[#allocation5 + $0xd0] sm:$0xff]  ;;  %p449_p6 = pnand %p448_p5, %p442_p2 }
  0x31   :  { %340 = vmatprep.subr.bf16.mxu0 %v339_v23  ;;  %369 = vmatprep.subr.bf16.mxu1 %v519_v0  ;;  %v67_v40 = vld [vmem:[#allocation5 + $0xc0] sm:$0xff]  ;;  %v347_v41 = vpack.c.bf16 %v71_v37, %v68_v36  ;;  %v72_v44 = vld [vmem:[#allocation5 + $0xe8] sm:$0xff]  ;;  %v74_v45 = vld [vmem:[#allocation5 + $0xf8] sm:$0xff] }
  0x32   :  { %v77_v46 = vld [vmem:[#allocation5 + $0x110] sm:$0xff]  ;;  %v349_v47 = vpack.c.bf16 %v70_v42, %v67_v40  ;;  %v376_v48 = vpack.c.bf16 %v72_v44, %v69_v43  ;;  %v76_v51 = vld [vmem:[#allocation5 + $0x108] sm:$0xff]  ;;  %v75_v52 = vld [vmem:[#allocation5 + $0x100] sm:$0xff] }
  0x33   :  { %v73_v49 = vld [vmem:[#allocation5 + $0xf0] sm:$0xff]  ;;  %v351_v50 = vpack.c.bf16 %v77_v46, %v74_v45  ;;  %v78_v53 = vld [vmem:[#allocation5 + $0x118] sm:$0xff]  ;;  %v80_v54 = vld [vmem:[#allocation5 + $0x128] sm:$0xff] }
  0x34   :  { %342 = vmatpush1.bf16.msra.mxu0 %v341_v29  ;;  %371 = vmatpush3.bf16.msra.mxu1 %v370_v30  ;;  %v83_v55 = vld [vmem:[#allocation5 + $0x140] sm:$0xff]  ;;  %v353_v56 = vpack.c.bf16 %v76_v51, %v73_v49  ;;  %v379_v57 = vpack.c.bf16 %v78_v53, %v75_v52  ;;  %v82_v60 = vld [vmem:[#allocation5 + $0x138] sm:$0xff]  ;;  %v81_v61 = vld [vmem:[#allocation5 + $0x130] sm:$0xff] }
  0x35   :  { %344 = vmatprep.subr.bf16.mxu0 %v343_v32  ;;  %372 = vmatprep.subr.bf16.mxu1 %v519_v0  ;;  %v79_v58 = vld [vmem:[#allocation5 + $0x120] sm:$0xff]  ;;  %v355_v59 = vpack.c.bf16 %v83_v55, %v80_v54  ;;  %v84_v62 = vld [vmem:[#allocation5 + $0x148] sm:$0xff]  ;;  %v86_v63 = vld [vmem:[#allocation5 + $0x158] sm:$0xff] }
  0x36   :  { %v89_v1 = vld [vmem:[#allocation5 + $0x170] sm:$0xff]  ;;  %v357_v2 = vpack.c.bf16 %v82_v60, %v79_v58  ;;  %v382_v3 = vpack.c.bf16 %v84_v62, %v81_v61  ;;  %v88_v6 = vld [vmem:[#allocation5 + $0x168] sm:$0xff]  ;;  %v87_v7 = vld [vmem:[#allocation5 + $0x160] sm:$0xff] }
  0x37   :  { %v85_v4 = vld [vmem:[#allocation5 + $0x150] sm:$0xff]  ;;  %v359_v5 = vpack.c.bf16 %v89_v1, %v86_v63  ;;  %v90_v8 = vld [vmem:[#allocation5 + $0x178] sm:$0xff] }
  0x38   :  { %346 = vmatpush1.bf16.msra.mxu0 %v345_v38  ;;  %374 = vmatpush3.bf16.msra.mxu1 %v373_v39  ;;  %v361_v9 = vpack.c.bf16 %v88_v6, %v85_v4  ;;  %v385_v10 = vpack.c.bf16 %v90_v8, %v87_v7  ;;  %v42_v11 = vld [vmem:[#allocation2] sm:$0xff] }
  0x39   :  { %348 = vmatprep.subr.bf16.mxu0 %v347_v41  ;;  %375 = vmatprep.subr.bf16.mxu1 %v519_v0 }
  0x3c   :  { %350 = vmatpush1.bf16.msra.mxu0 %v349_v47  ;;  %377 = vmatpush3.bf16.msra.mxu1 %v376_v48 }
  0x3d   :  { %352 = vmatprep.subr.bf16.mxu0 %v351_v50  ;;  %378 = vmatprep.subr.bf16.mxu1 %v519_v0 }
  0x40   :  { %354 = vmatpush1.bf16.msra.mxu0 %v353_v56  ;;  %380 = vmatpush3.bf16.msra.mxu1 %v379_v57 }
  0x41   :  { %356 = vmatprep.subr.bf16.mxu0 %v355_v59  ;;  %381 = vmatprep.subr.bf16.mxu1 %v519_v0 }
  0x44   :  { %358 = vmatpush1.bf16.msra.mxu0 %v357_v2  ;;  %383 = vmatpush3.bf16.msra.mxu1 %v382_v3 }
  0x45   :  { %360 = vmatprep.subr.bf16.mxu0 %v359_v5  ;;  %384 = vmatprep.subr.bf16.mxu1 %v519_v0 }
  0x48   :  { %362 = vmatpush1.bf16.msra.mxu0 %v361_v9  ;;  %386 = vmatpush3.bf16.msra.mxu1 %v385_v10 }
  0x4b   :  { %156 = vmatmul.mubr.f32.vlgmr.msra.gmra.mrb[0].mxu0 %v42_v11  ;;  %329 = vmatmul.mubr.f32.vlgmr.msra.gmra.mrb[0].mxu1 %v42_v11 }
 0x11e   :  { %v157_v12 = vpop.f32.mrb[0].mxu0  ;;  %v228_v13 = vpop.f32.mrb[0].mxu1 }
 0x11f   :  { %v232_v14 = vmul.f32 0.25, %v157_v12  ;;  %v159_v15 = vpop.f32.mrb[1].mxu0  ;;  %235 = vst [vmem:[#allocation10] sm:$0xff] %v228_v13  ;;  %v330_v16 = vpop.f32.mrb[1].mxu1 }
 0x120   :  { %234 = vst [vmem:[#allocation8] sm:$0xff] %v159_v15 }
 0x121   :  { %233 = vst [vmem:[#allocation7] sm:$0xff] %v232_v14 }
 0x122   :  { %452 = shalt.err (!%p449_p6)
}
 0x123   :  { %s453_s22 = scalar_lea.hbm %s642_s3, 128 }
 0x124   :  { %p454_p7 = scmp.ne.s32.totalorder %s642_s3, %s453_s22  ;;  %p457_p8 = scmp.lt.u32.totalorder %s453_s22, %s642_s3 }
 0x126   :  { %p459_p9 = pnand %p457_p8, %p454_p7 }
 0x128   :  { %462 = shalt.err (!%p459_p9)
}
 0x129   :  { %255 = dma.vmem_to_hbm [thread:$0]  %s253_s14, 128, %s642_s3, [#allocation9]  }
 0x12a   :  { %s463_s29 = scalar_lea.vmem %s589_s16, 128  ;;  %p468_p11 = scmp.lt.s32.totalorder %s589_s16, %s589_s16 }
 0x12b   :  { %p464_p10 = scmp.ne.s32.totalorder %s589_s16, %s463_s29  ;;  %p469_p12 = scmp.lt.s32.totalorder %s463_s29, %s463_s29 }
 0x12d   :  { %p470_p13 = por %p469_p12, %p468_p11 }
 0x12f   :  { %p471_p0 = pnand %p470_p13, %p464_p10 }
 0x131   :  { %474 = shalt.err (!%p471_p0)
}
 0x132   :  { %s475_s6 = scalar_lea.hbm %s641_s2, 128 }
 0x133   :  { %p476_p1 = scmp.ne.s32.totalorder %s641_s2, %s475_s6  ;;  %p479_p2 = scmp.lt.u32.totalorder %s475_s6, %s641_s2 }
 0x135   :  { %p481_p3 = pnand %p479_p2, %p476_p1 }
 0x137   :  { %484 = shalt.err (!%p481_p3)
}
 0x138   :  { %245 = dma.vmem_to_hbm [thread:$0]  %s589_s16, 128, %s641_s2, [#allocation4]  }
 0x139   :  { %s485_s11 = scalar_lea.vmem %s591_s18, 128  ;;  %p490_p5 = scmp.lt.s32.totalorder %s591_s18, %s591_s18 }
 0x13a   :  { %p486_p4 = scmp.ne.s32.totalorder %s591_s18, %s485_s11  ;;  %p491_p6 = scmp.lt.s32.totalorder %s485_s11, %s485_s11 }
 0x13c   :  { %p492_p7 = por %p491_p6, %p490_p5 }
 0x13e   :  { %p493_p8 = pnand %p492_p7, %p486_p4 }
 0x140   :  { %496 = shalt.err (!%p493_p8)
}
 0x141   :  { %s497_s1 = scalar_lea.hbm %s643_s4, 128 }
 0x142   :  { %p498_p9 = scmp.ne.s32.totalorder %s643_s4, %s497_s1  ;;  %p501_p10 = scmp.lt.u32.totalorder %s497_s1, %s643_s4 }
 0x144   :  { %p503_p11 = pnand %p501_p10, %p498_p9 }
 0x146   :  { %506 = shalt.err (!%p503_p11)
}
 0x147   :  { %265 = dma.vmem_to_hbm [thread:$0]  %s591_s18, 128, %s643_s4, [#allocation9]  }
 0x148   :  { %511 = dma.done.wait [#allocation4], 128  }
 0x149   :  { %512 = vsyncadd [#allocation4], 4294967168 }
 0x14a   :  { %513 = dma.done.wait [#allocation9], 256  }
 0x14b   :  { %514 = vsyncadd [#allocation9], 4294967040 }
 0x14c   :  { %275 = vsyncpa [#allocation3], 1 }
 0x14d   :  { %276 = vsyncpa [#allocation6], 1 }
 0x14e   :  { %277 = vsyncpa [#allocation4], 1 }
 0x14f   :  { %278 = vsyncpa [#allocation9], 1 }

</bundles_post_ra>
